<compile_context>
chip_gen: v7x
topology: tpu7x:2x2x1
jax: 0.10.0
libtpu: 0.0.40
codegen_flags: <defaults>
</compile_context>

<pallas_src>
import jax
import jax.numpy as jnp
from jax.experimental import pallas as pl
from jax.experimental.pallas import tpu as pltpu

_LANE = 128      # lane width: only the hidden axis of the weights is padded to it
_MAX_BM = 1024   # measured sweet spot for mem-bound tiles is ~512-1024 rows


def _round_up(v, m):
    return (v + m - 1) // m * m


def _pad_to(x, shape):
    pads = [(0, t - s) for s, t in zip(x.shape, shape)]
    if all(p == (0, 0) for p in pads):
        return x
    return jnp.pad(x, pads)


def _mlp_decoder_kernel(x_ref, w1_ref, b1_ref, w2_ref, b2_ref, o_ref):
    # x : (bm, in_dim)        -- natural feature width, no lane padding
    # w1: (in_dim, hid_p)     b1: (1, hid_p)
    # w2: (hid_p, out_dim)    b2: (1, out_dim)
    # o : (bm, out_dim)       -- natural output width
    x = x_ref[...].astype(w1_ref.dtype)   # in-kernel bf16 cast: no extra HBM traffic
    h = jnp.dot(x, w1_ref[...], preferred_element_type=jnp.float32) + b1_ref[...]
    h = jnp.maximum(h, 0.0)               # ReLU in fp32
    h = h.astype(w2_ref.dtype)            # feed the second matmul in the weight dtype
    logits = jnp.dot(h, w2_ref[...], preferred_element_type=jnp.float32) + b2_ref[...]
    o_ref[...] = logits.astype(o_ref.dtype)


def _vmem_budget_bytes():
    """~3/4 of this chip's VMEM (48 MiB on v7x, 96 MiB on v5e/v6e)."""
    try:
        cap = int(pltpu.get_tpu_info().vmem_capacity_bytes)
    except Exception:   # hardware query only; never masks kernel errors
        cap = 64 * 1024 * 1024   # conservative v7x assumption
    return max((cap * 3) // 4, 16 * 1024 * 1024)


def _select_bm(B, sublane, in_dim, hid_p, out_dim,
               x_itemsize, w_itemsize, out_itemsize, budget):
    """Batch tile: as large as VMEM allows, padding bounded to <= sublane/step."""
    b_aligned = _round_up(B, sublane)
    # Resident weights/biases are double-buffered by default buffering.
    weight_bytes = 2 * (w_itemsize * (in_dim * hid_p + hid_p * out_dim)
                        + 4 * (hid_p + out_dim))
    per_row = (2 * in_dim * x_itemsize          # double-buffered x tile
               + 2 * out_dim * out_itemsize     # double-buffered out tile
               + 4 * (hid_p + out_dim))         # fp32 intermediates
    avail = max(budget - weight_bytes, sublane * per_row)
    bm_cap = (avail // per_row) // sublane * sublane
    bm_cap = int(max(sublane, min(bm_cap, _MAX_BM, b_aligned)))

    n_steps = -(-b_aligned // bm_cap)           # only split when VMEM requires it
    if n_steps > 1 and n_steps % 2:
        # v7x: even step count so both TensorCores get equal work on the
        # "parallel" batch axis; cost is at most one extra sublane of padding
        # per step.  Harmless (no forced split) on single-TC v5e/v6e.
        n_steps += 1
    bm = _round_up(-(-b_aligned // n_steps), sublane)
    b_pad = n_steps * bm
    return bm, b_pad


def _run_pallas(x_p, w1_p, b1_p, w2_p, b2_p, *, bm, out_dtype, vmem_limit):
    B_pad, in_dim = x_p.shape
    hid_p = w1_p.shape[1]
    out_dim = w2_p.shape[1]
    grid = (B_pad // bm,)

    flops = 2 * B_pad * (in_dim * hid_p + hid_p * out_dim)
    bytes_accessed = int(
        x_p.size * x_p.dtype.itemsize
        + w1_p.size * w1_p.dtype.itemsize + b1_p.size * b1_p.dtype.itemsize
        + w2_p.size * w2_p.dtype.itemsize + b2_p.size * b2_p.dtype.itemsize
        + B_pad * out_dim * jnp.dtype(out_dtype).itemsize)

    return pl.pallas_call(
        _mlp_decoder_kernel,
        out_shape=jax.ShapeDtypeStruct((B_pad, out_dim), out_dtype),
        grid_spec=pltpu.PrefetchScalarGridSpec(
            num_scalar_prefetch=0,
            grid=grid,
            in_specs=[
                pl.BlockSpec((bm, in_dim), lambda i: (i, 0)),      # x tile (natural width)
                pl.BlockSpec((in_dim, hid_p), lambda i: (0, 0)),   # W1 (resident)
                pl.BlockSpec((1, hid_p), lambda i: (0, 0)),        # b1
                pl.BlockSpec((hid_p, out_dim), lambda i: (0, 0)),  # W2 (resident)
                pl.BlockSpec((1, out_dim), lambda i: (0, 0)),      # b2
            ],
            out_specs=pl.BlockSpec((bm, out_dim), lambda i: (i, 0)),  # natural width
        ),
        compiler_params=pltpu.CompilerParams(
            dimension_semantics=("parallel",),
            vmem_limit_bytes=int(vmem_limit),
        ),
        cost_estimate=pl.CostEstimate(
            flops=flops, transcendentals=0, bytes_accessed=bytes_accessed),
    )(x_p, w1_p, b1_p, w2_p, b2_p)


def prepare_decoder_params(w1, b1, w2, b2, *, use_bf16_matmul=True):
    """One-time weight prep hoisted off the hot path.

    w1: [in_dim, hidden] (transpose of torch Linear.weight), b1: [hidden] or [1, hidden]
    w2: [hidden, out_dim],                                   b2: [out_dim] or [1, out_dim]
    Pads only the hidden axis to a multiple of 128 (exact: padded columns/rows
    contribute zero) and casts weights to bf16 for the MXU by default.
    """
    in_dim, hidden = w1.shape
    out_dim = w2.shape[1]
    hid_p = _round_up(hidden, _LANE)

    w_dtype = jnp.bfloat16 if use_bf16_matmul else jnp.float32
    w1_p = _pad_to(jnp.asarray(w1, w_dtype), (in_dim, hid_p))
    w2_p = _pad_to(jnp.asarray(w2, w_dtype), (hid_p, out_dim))
    b1_p = _pad_to(jnp.asarray(b1, jnp.float32).reshape(1, hidden), (1, hid_p))
    b2_p = jnp.asarray(b2, jnp.float32).reshape(1, out_dim)
    return w1_p, b1_p, w2_p, b2_p


def intent_doc_labelling_forward(x, params, *, bm=None):
    """Pallas implementation of IntentDocLabellingModel.forward (== MLPDecoder)."""
    w1_p, b1_p, w2_p, b2_p = params
    B, in_dim = x.shape
    assert w1_p.shape[0] == in_dim, "prepared W1 does not match input feature dim"
    hid_p = w1_p.shape[1]
    out_dim = w2_p.shape[1]
    out_dtype = x.dtype
    out_itemsize = jnp.dtype(out_dtype).itemsize

    sublane = 16 if x.dtype == jnp.bfloat16 else 8
    budget = _vmem_budget_bytes()

    if bm is None:
        bm, B_pad = _select_bm(B, sublane, in_dim, hid_p, out_dim,
                               x.dtype.itemsize, w1_p.dtype.itemsize,
                               out_itemsize, budget)
    else:
        bm = max(sublane, _round_up(int(bm), sublane))
        B_pad = _round_up(max(B, bm), bm)

    # Explicit scoped-VMEM limit from the actual double-buffered footprint,
    # capped at the generation-aware budget (keeps headroom for Mosaic scratch).
    weight_bytes = 2 * (w1_p.nbytes + b1_p.nbytes + w2_p.nbytes + b2_p.nbytes)
    tile_bytes = bm * (2 * in_dim * x.dtype.itemsize
                       + 2 * out_dim * out_itemsize
                       + 4 * (hid_p + out_dim))
    vmem_limit = min(budget,
                     max((3 * (weight_bytes + tile_bytes)) // 2, 32 * 1024 * 1024))

    x_p = _pad_to(x, (B_pad, in_dim))   # batch pad only (<= one sublane per step)
    out = _run_pallas(x_p, w1_p, b1_p, w2_p, b2_p,
                      bm=bm, out_dtype=out_dtype, vmem_limit=vmem_limit)
    return out if B_pad == B else out[:B]


def init_params(key, in_dim, hidden, out_dim, dtype=jnp.float32):
    """Deterministic synthetic parameters matching MLPDecoder's Linear shapes."""
    k1, k2, k3, k4 = jax.random.split(key, 4)
    # Stored as [in, out] (transpose of torch Linear.weight); see layout note.
    w1 = jax.random.normal(k1, (in_dim, hidden), dtype) * (1.0 / jnp.sqrt(in_dim))
    b1 = jax.random.normal(k2, (1, hidden), dtype) * 0.01
    w2 = jax.random.normal(k3, (hidden, out_dim), dtype) * (1.0 / jnp.sqrt(hidden))
    b2 = jax.random.normal(k4, (1, out_dim), dtype) * 0.01
    return w1, b1, w2, b2


# TODO(synk): encode()/get_results()/get_loss() use DocNNEncoder/ClassificationHead
# which are not part of forward(); only forward (MLPDecoder) is implemented here.


if __name__ == "__main__":
    key = jax.random.PRNGKey(0)
    k_x, k_p = jax.random.split(key)

    # Small shapes consistent with an MLPDecoder document classifier.
    B, in_dim, hidden, out_dim = 32, 32, 64, 16
    x = jax.random.normal(k_x, (B, in_dim), jnp.float32)
    w1, b1, w2, b2 = init_params(k_p, in_dim, hidden, out_dim)

    # Reference in plain JAX.
    ref = jnp.maximum(x @ w1 + b1, 0.0) @ w2 + b2

    # fp32-weight path (strict numerical check).
    params_f32 = prepare_decoder_params(w1, b1, w2, b2, use_bf16_matmul=False)
    logits = jax.block_until_ready(intent_doc_labelling_forward(x, params_f32))
    assert logits.shape == (B, out_dim)
    assert jnp.allclose(logits, ref, atol=1e-5, rtol=1e-5)

    # Default bf16-operand MXU path (fp32 accumulation), prepared once.
    params_bf16 = prepare_decoder_params(w1, b1, w2, b2)
    logits_bf16 = jax.block_until_ready(intent_doc_labelling_forward(x, params_bf16))
    assert logits_bf16.shape == (B, out_dim)
    assert jnp.allclose(logits_bf16, ref, atol=5e-2, rtol=5e-2)

    print("KERNEL_OK")
</pallas_src>

<mosaic_0001>
module attributes {stable_mosaic.version = 11 : i64} {
  func.func @_mlp_decoder_kernel(%arg0: i32, %arg1: memref<32x32xf32, #tpu.memory_space<vmem>>, %arg2: memref<32x128xf32, #tpu.memory_space<vmem>>, %arg3: memref<1x128xf32, #tpu.memory_space<vmem>>, %arg4: memref<128x16xf32, #tpu.memory_space<vmem>>, %arg5: memref<1x16xf32, #tpu.memory_space<vmem>>, %arg6: memref<32x16xf32, #tpu.memory_space<vmem>>) attributes {dimension_semantics = [#tpu.dimension_semantics<parallel>], iteration_bounds = array<i64: 1>, scalar_prefetch = 0 : i64, scratch_operands = 0 : i64, tpu.core_type = #tpu.core_type<tc>, window_params = [{transform_indices = @transform_0, window_bounds = array<i64: 32, 32>}, {pipeline_mode = #tpu.pipeline_mode<synchronous>, transform_indices = @transform_1, window_bounds = array<i64: 32, 128>}, {pipeline_mode = #tpu.pipeline_mode<synchronous>, transform_indices = @transform_2, window_bounds = array<i64: 1, 128>}, {pipeline_mode = #tpu.pipeline_mode<synchronous>, transform_indices = @transform_3, window_bounds = array<i64: 128, 16>}, {pipeline_mode = #tpu.pipeline_mode<synchronous>, transform_indices = @transform_4, window_bounds = array<i64: 1, 16>}, {transform_indices = @transform_5, window_bounds = array<i64: 32, 16>}]} {
    %c0 = arith.constant 0 : index
    %c0_0 = arith.constant 0 : index
    %0 = vector.load %arg1[%c0, %c0_0] : memref<32x32xf32, #tpu.memory_space<vmem>>, vector<32x32xf32>
    %c0_1 = arith.constant 0 : index
    %c0_2 = arith.constant 0 : index
    %1 = vector.load %arg2[%c0_1, %c0_2] : memref<32x128xf32, #tpu.memory_space<vmem>>, vector<32x128xf32>
    %cst = arith.constant dense<0.000000e+00> : vector<32x128xf32>
    %2 = tpu.matmul %0, %1, %cst {dimension_numbers = #tpu.dot_dimension_numbers<[1], [0], [0], [1], [0, 0, 1, 1], [], []>} : vector<32x32xf32>, vector<32x128xf32>, vector<32x128xf32> -> vector<32x128xf32>
    %c0_3 = arith.constant 0 : index
    %c0_4 = arith.constant 0 : index
    %3 = vector.load %arg3[%c0_3, %c0_4] : memref<1x128xf32, #tpu.memory_space<vmem>>, vector<1x128xf32>
    %4 = vector.broadcast %3 : vector<1x128xf32> to vector<32x128xf32>
    %5 = arith.addf %2, %4 : vector<32x128xf32>
    %cst_5 = arith.constant 0.000000e+00 : f32
    %6 = vector.broadcast %cst_5 : f32 to vector<32x128xf32>
    %7 = arith.maximumf %5, %6 : vector<32x128xf32>
    %c0_6 = arith.constant 0 : index
    %c0_7 = arith.constant 0 : index
    %8 = vector.load %arg4[%c0_6, %c0_7] : memref<128x16xf32, #tpu.memory_space<vmem>>, vector<128x16xf32>
    %cst_8 = arith.constant dense<0.000000e+00> : vector<32x16xf32>
    %9 = tpu.matmul %7, %8, %cst_8 {dimension_numbers = #tpu.dot_dimension_numbers<[1], [0], [0], [1], [0, 0, 1, 1], [], []>} : vector<32x128xf32>, vector<128x16xf32>, vector<32x16xf32> -> vector<32x16xf32>
    %c0_9 = arith.constant 0 : index
    %c0_10 = arith.constant 0 : index
    %10 = vector.load %arg5[%c0_9, %c0_10] : memref<1x16xf32, #tpu.memory_space<vmem>>, vector<1x16xf32>
    %11 = vector.broadcast %10 : vector<1x16xf32> to vector<32x16xf32>
    %12 = arith.addf %9, %11 : vector<32x16xf32>
    %c0_11 = arith.constant 0 : index
    %c0_12 = arith.constant 0 : index
    %13 = vector.load %arg6[%c0_11, %c0_12] : memref<32x16xf32, #tpu.memory_space<vmem>>, vector<32x16xf32>
    tpu.vector_store %arg6[%c0_11, %c0_12], %12 {strides = array<i32>} : memref<32x16xf32, #tpu.memory_space<vmem>>, vector<32x16xf32>,
    return
  }
  func.func @transform_0(%arg0: i32) -> (i32, i32) {
    %c0_i32 = arith.constant 0 : i32
    %c0_i32_0 = arith.constant 0 : i32
    return %arg0, %c0_i32 : i32, i32
  }
  func.func @transform_1(%arg0: i32) -> (i32, i32) {
    %c0_i32 = arith.constant 0 : i32
    %c0_i32_0 = arith.constant 0 : i32
    %c0_i32_1 = arith.constant 0 : i32
    return %c0_i32, %c0_i32_0 : i32, i32
  }
  func.func @transform_2(%arg0: i32) -> (i32, i32) {
    %c0_i32 = arith.constant 0 : i32
    %c0_i32_0 = arith.constant 0 : i32
    %c0_i32_1 = arith.constant 0 : i32
    return %c0_i32, %c0_i32_0 : i32, i32
  }
  func.func @transform_3(%arg0: i32) -> (i32, i32) {
    %c0_i32 = arith.constant 0 : i32
    %c0_i32_0 = arith.constant 0 : i32
    %c0_i32_1 = arith.constant 0 : i32
    return %c0_i32, %c0_i32_0 : i32, i32
  }
  func.func @transform_4(%arg0: i32) -> (i32, i32) {
    %c0_i32 = arith.constant 0 : i32
    %c0_i32_0 = arith.constant 0 : i32
    %c0_i32_1 = arith.constant 0 : i32
    return %c0_i32, %c0_i32_0 : i32, i32
  }
  func.func @transform_5(%arg0: i32) -> (i32, i32) {
    %c0_i32 = arith.constant 0 : i32
    %c0_i32_0 = arith.constant 0 : i32
    return %arg0, %c0_i32 : i32, i32
  }
}

</mosaic_0001>

<bundles_post_ra>
// kernel: tpu_custom_call.1
= control target key start
LH: loop header
LB: loop body
LE: loop exit
PB: predicated region body
PF: predicated region fallthrough
CT: control target
= control target key end

     0   :  { %vm35_vm0 = vcmask 261120   ;;  %vm245_vm1 = vcmask 130048   ;;  %s504_s1 = inlined_call_operand.vmem [shape: f32[32,128], index: 1, kind: input, shape index: {}]   ;;  %s505_s0 = inlined_call_operand.vmem [shape: f32[32,32], index: 0, kind: input, shape index: {}]   ;;  %s506_s3 = inlined_call_operand.vmem [shape: f32[128,16], index: 3, kind: input, shape index: {}]   ;;  %s507_s2 = inlined_call_operand.vmem [shape: f32[1,128], index: 2, kind: input, shape index: {}]   ;;  %s508_s4 = inlined_call_operand.vmem [shape: f32[1,16], index: 4, kind: input, shape index: {}]   ;;  %s509_s5 = inlined_call_operand.vmem [shape: f32[32,16], index: 5, kind: output, shape index: {}]  }
   0x1   :  { %v24_v0 = vld [vmem:[%s504_s1] sm:$0xff]  ;;  %v25_v1 = vld [vmem:[%s504_s1 + $0x8] sm:$0xff]  ;;  %v26_v2 = vld [vmem:[%s504_s1 + $0x10] sm:$0xff] }
   0x2   :  { %v340_v3 = vpack.c.bf16 %v25_v1, %v24_v0  ;;  %v27_v4 = vld [vmem:[%s504_s1 + $0x18] sm:$0xff]  ;;  %v20_v5 = vld [vmem:[%s505_s0] sm:$0xff]  ;;  %v138_v8 = vld [vmem:[%s506_s3 + $0x8] sm:$0xff] }
   0x3   :  { %v344_v6 = vpack.c.bf16 %v27_v4, %v26_v2  ;;  %296 = vmatprep.mubr.msk.f32.mxu0 %vm35_vm0, %v20_v5  ;;  %v137_v7 = vld [vmem:[%s506_s3] sm:$0xff]  ;;  %v139_v9 = vld [vmem:[%s506_s3 + $0x10] sm:$0xff]  ;;  %v140_v10 = vld [vmem:[%s506_s3 + $0x18] sm:$0xff] }
   0x4   :  { %341 = vmatprep.subr.bf16.mxu0 %v340_v3  ;;  %v348_v11 = vpack.c.bf16 %v138_v8, %v137_v7  ;;  %v352_v12 = vpack.c.bf16 %v140_v10, %v139_v9  ;;  %v141_v13 = vld [vmem:[%s506_s3 + $0x20] sm:$0xff]  ;;  %v142_v14 = vld [vmem:[%s506_s3 + $0x28] sm:$0xff]  ;;  %v22_v17 = vld [vmem:[%s505_s0 + $0x10] sm:$0xff] }
   0x5   :  { %343 = vmatpush3.bf16.msra.mxu0 %v340_v3  ;;  %v21_v15 = vld [vmem:[%s505_s0 + $0x8] sm:$0xff]  ;;  %v356_v16 = vpack.c.bf16 %v142_v14, %v141_v13  ;;  %v143_v18 = vld [vmem:[%s506_s3 + $0x30] sm:$0xff]  ;;  %v144_v19 = vld [vmem:[%s506_s3 + $0x38] sm:$0xff] }
   0x6   :  { %345 = vmatprep.subr.bf16.mxu0 %v344_v6  ;;  %349 = vmatprep.subr.bf16.mxu1 %v348_v11  ;;  %v23_v20 = vld [vmem:[%s505_s0 + $0x18] sm:$0xff]  ;;  %v360_v21 = vpack.c.bf16 %v144_v19, %v143_v18  ;;  %v145_v22 = vld [vmem:[%s506_s3 + $0x40] sm:$0xff]  ;;  %v146_v23 = vld [vmem:[%s506_s3 + $0x48] sm:$0xff] }
   0x7   :  { %351 = vmatpush3.bf16.msra.mxu1 %v348_v11  ;;  %v364_v24 = vpack.c.bf16 %v146_v23, %v145_v22  ;;  %v147_v25 = vld [vmem:[%s506_s3 + $0x50] sm:$0xff]  ;;  %v148_v26 = vld [vmem:[%s506_s3 + $0x58] sm:$0xff]  ;;  %v149_v28 = vld [vmem:[%s506_s3 + $0x60] sm:$0xff] }
   0x8   :  { %353 = vmatprep.subr.bf16.mxu1 %v352_v12  ;;  %v368_v27 = vpack.c.bf16 %v148_v26, %v147_v25  ;;  %v150_v29 = vld [vmem:[%s506_s3 + $0x68] sm:$0xff]  ;;  %v151_v31 = vld [vmem:[%s506_s3 + $0x70] sm:$0xff]  ;;  %v152_v32 = vld [vmem:[%s506_s3 + $0x78] sm:$0xff] }
   0x9   :  { %347 = vmatpush3.bf16.msra.mxu0 %v344_v6  ;;  %v372_v30 = vpack.c.bf16 %v150_v29, %v149_v28  ;;  %v376_v33 = vpack.c.bf16 %v152_v32, %v151_v31  ;;  %v254_v34 = vld [vmem:[%s507_s2] ss:$0 sm:$0xff] }
   0xa   :  { %v259_v47 = vld [vmem:[%s508_s4] ss:$0 sm:$0xff] }
   0xb   :  { %355 = vmatpush3.bf16.msra.mxu1 %v352_v12 }
   0xc   :  { %297 = vmatmul.mubr.msk.f32.vlgmr.msra.gmra.mrb[0].mxu0 %vm35_vm0, %v21_v15  ;;  %357 = vmatprep.subr.bf16.mxu1 %v356_v16 }
   0xd   :  { %299 = vmatprep.mubr.msk.f32.mxu0 %vm35_vm0, %v22_v17 }
   0xf   :  { %359 = vmatpush3.bf16.msra.mxu1 %v356_v16 }
  0x10   :  { %300 = vmatmul.mubr.msk.f32.gmra.mrb[2].mxu0 %vm35_vm0, %v23_v20  ;;  %361 = vmatprep.subr.bf16.mxu1 %v360_v21 }
  0x13   :  { %363 = vmatpush3.bf16.msra.mxu1 %v360_v21 }
  0x14   :  { %365 = vmatprep.subr.bf16.mxu1 %v364_v24 }
  0x17   :  { %367 = vmatpush3.bf16.msra.mxu1 %v364_v24 }
  0x18   :  { %369 = vmatprep.subr.bf16.mxu1 %v368_v27 }
  0x1b   :  { %371 = vmatpush3.bf16.msra.mxu1 %v368_v27 }
  0x1c   :  { %373 = vmatprep.subr.bf16.mxu1 %v372_v30 }
  0x1f   :  { %375 = vmatpush3.bf16.msra.mxu1 %v372_v30 }
  0x20   :  { %377 = vmatprep.subr.bf16.mxu1 %v376_v33 }
  0x23   :  { %379 = vmatpush3.bf16.msra.mxu1 %v376_v33 }
  0xdf   :  { %v298_v35 = vpop.f32.mrb[0].mxu0 }
  0xe0   :  { %v120_v36 = vadd.f32 %v298_v35, %v254_v34  ;;  %v114_v37 = vpop.f32.mrb[1].mxu0 }
  0xe1   :  { %v115_v38 = vadd.f32 %v254_v34, %v114_v37 }
  0xe2   :  { %v134_v41 = vmax.f32 %v120_v36, 0.0 }
  0xe3   :  { %v301_v39 = vpop.f32.mrb[2].mxu0  ;;  %v133_v40 = vmax.f32 %v115_v38, 0.0 }
  0xe4   :  { %v130_v42 = vadd.f32 %v301_v39, %v254_v34  ;;  %v124_v43 = vpop.f32.mrb[3].mxu0 }
  0xe5   :  { %v125_v44 = vadd.f32 %v254_v34, %v124_v43  ;;  %334 = vmatprep.mubr.f32.mxu1 %v133_v40 }
  0xe6   :  { %335 = vmatmul.mubr.f32.vlgmr.msra.gmra.mrb[0].mxu1 %v134_v41  ;;  %v136_v46 = vmax.f32 %v130_v42, 0.0 }
  0xe7   :  { %v135_v45 = vmax.f32 %v125_v44, 0.0 }
  0xe9   :  { %337 = vmatprep.mubr.f32.mxu1 %v135_v45 }
  0xea   :  { %338 = vmatmul.mubr.f32.gmra.mrb[2].mxu1 %v136_v46 }
 0x1b9   :  { %v336_v48 = vpop.f32.mrb[0].mxu1 }
 0x1ba   :  { %v232_v49 = vadd.f32 %v336_v48, %v259_v47  ;;  %v226_v50 = vpop.f32.mrb[1].mxu1 }
 0x1bb   :  { %v227_v51 = vadd.f32 %v259_v47, %v226_v50 }
 0x1bc   :  { %247 = vst.msk [vmem:[%s509_s5 + $0x8] sm:$0xff] %vm245_vm1, %v232_v49 }
 0x1bd   :  { %246 = vst.msk [vmem:[%s509_s5] sm:$0xff] %vm245_vm1, %v227_v51  ;;  %v339_v52 = vpop.f32.mrb[2].mxu1 }
 0x1be   :  { %v242_v53 = vadd.f32 %v339_v52, %v259_v47  ;;  %v236_v54 = vpop.f32.mrb[3].mxu1 }
 0x1bf   :  { %v237_v55 = vadd.f32 %v259_v47, %v236_v54 }
 0x1c0   :  { %249 = vst.msk [vmem:[%s509_s5 + $0x18] sm:$0xff] %vm245_vm1, %v242_v53 }
 0x1c1   :  { %248 = vst.msk [vmem:[%s509_s5 + $0x10] sm:$0xff] %vm245_vm1, %v237_v55 }

</bundles_post_ra>
